<compile_context>
chip_gen: v7x
topology: tpu7x:2x2x1
jax: 0.10.0
libtpu: 0.0.40
codegen_flags: <defaults>
</compile_context>

<pallas_src>
import functools

import jax
import jax.numpy as jnp
from jax.experimental import pallas as pl
from jax.experimental.pallas import tpu as pltpu


def minout_kernel(x_ref, o_ref, *, arity, C):
    # x_ref: (TB, F) tile in VMEM with F = arity * C.
    # Unrolled elementwise minimum over `arity` contiguous C-wide slabs.
    # (For very large arity a grid reduction axis would be preferable; for the
    #  typical arity=2..4 the unrolled VPU chain is strictly better.)
    acc = x_ref[:, pl.ds(0, C)]
    for k in range(1, arity):
        acc = jnp.minimum(acc, x_ref[:, pl.ds(k * C, C)])
    o_ref[...] = acc


def minout(x, arity, *, tb=None, vmem_limit_bytes=None):
    """Pallas MinOut: min over `arity` groups of the feature axis.

    x: (B, F) with F divisible by `arity`.
    returns: (B, F // arity), same dtype as x.
    """
    B, F = x.shape
    assert F % arity == 0, "feature dim must be divisible by arity"
    C = F // arity

    itemsize = jnp.dtype(x.dtype).itemsize

    if tb is None:
        # ~8 MiB per input buffer (Pallas double-buffers it), conservative for
        # every generation's scoped-VMEM default. Round to a sublane multiple.
        budget_bytes = 8 * 1024 * 1024
        rows = max(8, budget_bytes // max(1, F * itemsize))
        rows = (rows // 8) * 8
        tb = B if B <= rows else rows
    tb = min(tb, B)
    if tb < B:
        # when tiling, keep the second-minor block dim sublane-aligned
        tb = max(8, (tb // 8) * 8)

    grid = (pl.cdiv(B, tb),)

    kernel = functools.partial(minout_kernel, arity=arity, C=C)

    return pl.pallas_call(
        kernel,
        out_shape=jax.ShapeDtypeStruct((B, C), x.dtype),
        grid=grid,
        in_specs=[pl.BlockSpec((tb, F), lambda i: (i, 0))],
        out_specs=pl.BlockSpec((tb, C), lambda i: (i, 0)),
        compiler_params=pltpu.CompilerParams(
            dimension_semantics=("parallel",),
            vmem_limit_bytes=vmem_limit_bytes,
        ),
    )(x)


if __name__ == "__main__":
    key = jax.random.PRNGKey(0)

    # Small shape consistent with the module: batch=2, arity=4, C=32 -> F=128.
    B, arity, C = 2, 4, 32
    x = jax.random.normal(key, (B, arity * C), dtype=jnp.float32)

    out = minout(x, arity)
    out = jax.block_until_ready(out)

    ref = jnp.min(x.reshape(B, arity, C), axis=1)
    assert out.shape == (B, C)
    assert out.dtype == x.dtype
    assert jnp.allclose(out, ref), "Pallas MinOut mismatch vs reference (small)"

    # Second check exercising the tiled / multi-grid-point path.
    key2 = jax.random.PRNGKey(1)
    B2, arity2, C2 = 64, 2, 128
    x2 = jax.random.normal(key2, (B2, arity2 * C2), dtype=jnp.float32)
    out2 = jax.block_until_ready(minout(x2, arity2, tb=16))
    ref2 = jnp.min(x2.reshape(B2, arity2, C2), axis=1)
    assert jnp.allclose(out2, ref2), "Pallas MinOut mismatch vs reference (tiled)"

    print("KERNEL_OK")
</pallas_src>

<mosaic_0001>
module attributes {stable_mosaic.version = 11 : i64} {
  func.func @minout_kernel(%arg0: i32, %arg1: memref<2x128xf32, #tpu.memory_space<vmem>>, %arg2: memref<2x32xf32, #tpu.memory_space<vmem>>) attributes {dimension_semantics = [#tpu.dimension_semantics<parallel>], iteration_bounds = array<i64: 1>, scalar_prefetch = 0 : i64, scratch_operands = 0 : i64, tpu.core_type = #tpu.core_type<tc>, window_params = [{transform_indices = @transform_0, window_bounds = array<i64: 2, 128>}, {transform_indices = @transform_1, window_bounds = array<i64: 2, 32>}]} {
    %c0 = arith.constant 0 : index
    %c0_0 = arith.constant 0 : index
    %0 = vector.load %arg1[%c0, %c0_0] : memref<2x128xf32, #tpu.memory_space<vmem>>, vector<2x32xf32>
    %c0_1 = arith.constant 0 : index
    %c32 = arith.constant 32 : index
    %1 = vector.load %arg1[%c0_1, %c32] : memref<2x128xf32, #tpu.memory_space<vmem>>, vector<2x32xf32>
    %2 = arith.minimumf %0, %1 : vector<2x32xf32>
    %c0_2 = arith.constant 0 : index
    %c64 = arith.constant 64 : index
    %3 = vector.load %arg1[%c0_2, %c64] : memref<2x128xf32, #tpu.memory_space<vmem>>, vector<2x32xf32>
    %4 = arith.minimumf %2, %3 : vector<2x32xf32>
    %c0_3 = arith.constant 0 : index
    %c96 = arith.constant 96 : index
    %5 = vector.load %arg1[%c0_3, %c96] : memref<2x128xf32, #tpu.memory_space<vmem>>, vector<2x32xf32>
    %6 = arith.minimumf %4, %5 : vector<2x32xf32>
    %c0_4 = arith.constant 0 : index
    %c0_5 = arith.constant 0 : index
    %7 = vector.load %arg2[%c0_4, %c0_5] : memref<2x32xf32, #tpu.memory_space<vmem>>, vector<2x32xf32>
    tpu.vector_store %arg2[%c0_4, %c0_5], %6 {strides = array<i32>} : memref<2x32xf32, #tpu.memory_space<vmem>>, vector<2x32xf32>,
    return
  }
  func.func @transform_0(%arg0: i32) -> (i32, i32) {
    %c0_i32 = arith.constant 0 : i32
    %c0_i32_0 = arith.constant 0 : i32
    return %arg0, %c0_i32 : i32, i32
  }
  func.func @transform_1(%arg0: i32) -> (i32, i32) {
    %c0_i32 = arith.constant 0 : i32
    %c0_i32_0 = arith.constant 0 : i32
    return %arg0, %c0_i32 : i32, i32
  }
}

</mosaic_0001>

<bundles_post_ra>
// kernel: tpu_custom_call.1
= control target key start
LH: loop header
LB: loop body
LE: loop exit
PB: predicated region body
PF: predicated region fallthrough
CT: control target
= control target key end

     0   :  { %6 = vsyncpa [#allocation3], 0  ;;  %s144_s0 = inlined_call_operand.hbm [shape: f32[2,128], index: 0, kind: input, shape index: {}]   ;;  %s145_s1 = inlined_call_operand.hbm [shape: f32[2,32], index: 1, kind: output, shape index: {}]  }
   0x1   :  { %7 = vsyncpa [#allocation4], 0  ;;  %s105_s6 = smov [#allocation2]   ;;  %s57_s10 = scalar_lea.hbm %s144_s0, 32 }
   0x2   :  { %s14_s7 = sshll.u32 %s105_s6, 4  ;;  %p58_p0 = scmp.ne.s32.totalorder %s144_s0, %s57_s10  ;;  %s15_s7 = int_to_ptr.vmem [resolvable:$true] %s14_s7 }
   0x3   :  { %p61_p1 = scmp.lt.u32.totalorder %s57_s10, %s144_s0 }
   0x5   :  { %p63_p2 = pnand %p61_p1, %p58_p0 }
   0x7   :  { %66 = shalt.err (!%p63_p2)
}
   0x8   :  { %s67_s15 = scalar_lea.vmem %s15_s7, 32  ;;  %p72_p4 = scmp.lt.s32.totalorder %s15_s7, %s15_s7 }
   0x9   :  { %p68_p3 = scmp.ne.s32.totalorder %s15_s7, %s67_s15  ;;  %p73_p5 = scmp.lt.s32.totalorder %s67_s15, %s67_s15 }
   0xb   :  { %p74_p6 = por %p73_p5, %p72_p4 }
   0xd   :  { %p75_p7 = pnand %p74_p6, %p68_p3 }
   0xf   :  { %78 = shalt.err (!%p75_p7)
}
  0x10   :  { %17 = dma.hbm_to_vmem [thread:$0]  %s144_s0, 32, %s15_s7, [#allocation3]  }
  0x11   :  { %101 = dma.done.wait [#allocation3], 32  }
  0x12   :  { %102 = vsyncadd [#allocation3], 4294967264  ;;  %v21_v0 = vld [vmem:[#allocation2] sm:$0x3]  ;;  %s106_s18 = smov 96   ;;  %s107_s19 = smov 32  }
  0x13   :  { %23 = vrot.lane.b32.xlu0 %v21_v0, %s106_s18  ;;  %31 = vrot.lane.b32.xlu1 %v21_v0, %s107_s19  ;;  %s108_s20 = smov 64   ;;  %s109_s21 = smov [#allocation5]   ;;  %vm35_vm0 = vcmask 254976  }
  0x14   :  { %s43_s22 = sshll.u32 %s109_s21, 4  ;;  %s44_s22 = int_to_ptr.vmem [resolvable:$true] %s43_s22 }
  0x15   :  { %s79_s0 = scalar_lea.vmem %s44_s22, 32  ;;  %p84_p9 = scmp.lt.s32.totalorder %s44_s22, %s44_s22 }
  0x16   :  { %p80_p8 = scmp.ne.s32.totalorder %s44_s22, %s79_s0  ;;  %p85_p10 = scmp.lt.s32.totalorder %s79_s0, %s79_s0 }
  0x17   :  { %27 = vrot.lane.b32.xlu0 %v21_v0, %s108_s20 }
  0x18   :  { %p86_p11 = por %p85_p10, %p84_p9 }
  0x1a   :  { %p87_p12 = pnand %p86_p11, %p80_p8 }
  0x85   :  { %v24_v1 = vpop.permute.xlu0 %23  ;;  %v32_v4 = vpop.permute.xlu1 %31 }
  0x86   :  { %v26_v2 = vmin.f32 %v21_v0, %v24_v1 }
  0x89   :  { %v28_v3 = vpop.permute.xlu0 %27 }
  0x8a   :  { %v30_v5 = vmin.f32 %v26_v2, %v28_v3 }
  0x8c   :  { %v34_v6 = vmin.f32 %v30_v5, %v32_v4 }
  0x8e   :  { %36 = vst.msk [vmem:[#allocation5] sm:$0x3] %vm35_vm0, %v34_v6 }
  0x8f   :  { %90 = shalt.err (!%p87_p12)
}
  0x90   :  { %s91_s25 = scalar_lea.hbm %s145_s1, 32 }
  0x91   :  { %p92_p13 = scmp.ne.s32.totalorder %s145_s1, %s91_s25  ;;  %p95_p0 = scmp.lt.u32.totalorder %s91_s25, %s145_s1 }
  0x93   :  { %p97_p1 = pnand %p95_p0, %p92_p13 }
  0x95   :  { %100 = shalt.err (!%p97_p1)
}
  0x96   :  { %46 = dma.vmem_to_hbm [thread:$0]  %s44_s22, 32, %s145_s1, [#allocation4]  }
  0x97   :  { %103 = dma.done.wait [#allocation4], 32  }
  0x98   :  { %104 = vsyncadd [#allocation4], 4294967264 }
  0x99   :  { %50 = vsyncpa [#allocation3], 1 }
  0x9a   :  { %51 = vsyncpa [#allocation4], 1 }

</bundles_post_ra>
